<compile_context>
chip_gen: v7x
topology: tpu7x:2x2x1
jax: 0.10.0
libtpu: 0.0.40
codegen_flags: <defaults>
</compile_context>

<pallas_src>
import functools

import jax
import jax.numpy as jnp
from jax import lax
from jax.experimental import pallas as pl
from jax.experimental.pallas import tpu as pltpu

HIDDEN = 256
LN_EPS = 1e-5   # nn.LayerNorm default
LANE = 128


def _round_up(n, m):
    return (n + m - 1) // m * m


def _ln_normalize(h):
    """LayerNorm without the affine (gamma/beta are folded into the next
    Linear).  One-pass moments: var = E[h^2] - mu^2, both reductions can
    issue back-to-back on the XLU.  f32 math (v5e has no bf16 VPU/EUP)."""
    mu = jnp.mean(h, axis=-1, keepdims=True)
    ms = jnp.mean(h * h, axis=-1, keepdims=True)
    var = jnp.maximum(ms - mu * mu, 0.0)
    return (h - mu) * lax.rsqrt(var + LN_EPS)


def value_network_kernel(x_ref, w1_ref, b1_ref, w2_ref, b2_ref,
                         w3_ref, b3_ref, o_ref):
    # Layer 1: Linear(state_dim, 256) -> ReLU -> LayerNorm (affine folded fwd).
    # x is cast to bf16 here (no separate HBM pad/cast pass in the wrapper).
    x = x_ref[...].astype(jnp.bfloat16)
    h = jnp.dot(x, w1_ref[...], preferred_element_type=jnp.float32)
    h = jnp.maximum(h + b1_ref[...], 0.0)
    h = _ln_normalize(h)

    # Layer 2: Linear(256, 256) -> ReLU -> LayerNorm (affine folded fwd).
    h = jnp.dot(h.astype(jnp.bfloat16), w2_ref[...],
                preferred_element_type=jnp.float32)
    h = jnp.maximum(h + b2_ref[...], 0.0)
    h = _ln_normalize(h)

    # Layer 3: Linear(256, 1) as a VPU multiply + lane reduction (an N=1 MXU
    # matmul would use 1/256 of the array).  keepdims gives a (bb, 1) result
    # directly in sublane layout -> no cross-unit relayout before the store.
    out = jnp.sum(h * w3_ref[...], axis=-1, keepdims=True) + b3_ref[...]
    o_ref[...] = out.astype(o_ref.dtype)


@functools.partial(jax.jit, static_argnames=("block_b",))
def value_network_forward(x, params, *, block_b=1024):
    B, state_dim = x.shape
    (w1, b1, g1, bt1, w2, b2, g2, bt2, w3, b3) = params

    # ---- batch tiling -------------------------------------------------------
    bb = max(8, min(block_b, B))
    if B >= 2 * LANE:
        # v7x has 2 TensorCores; keep >= 2 steps on the "parallel" grid axis
        # (costs at most one extra ~0.35 us step on single-TC v5e/v6e).
        bb = min(bb, (B + 1) // 2)
    bb = _round_up(bb, 8)                     # sublane alignment
    Bp = _round_up(B, bb)
    n_blk = Bp // bb

    # Only pad the batch dim (in x's native dtype) when it is ragged; the
    # feature dim is passed unpadded (full-extent last dim in the BlockSpec).
    x_in = x if Bp == B else jnp.pad(x, ((0, Bp - B), (0, 0)))

    # ---- fold LayerNorm affines into the adjacent Linears (trace-time) ------
    # LN1: (n1*g1 + bt1) @ w2 + b2 == n1 @ (g1[:,None]*w2) + (bt1 @ w2 + b2)
    w1_b = w1.astype(jnp.bfloat16)
    w2_f = (g1.reshape(HIDDEN, 1) * w2).astype(jnp.bfloat16)
    b2_f = (bt1.reshape(1, HIDDEN) @ w2 + b2.reshape(1, HIDDEN)).astype(jnp.float32)
    # LN2: (n2*g2 + bt2) @ w3 + b3 == n2 @ (g2*w3) + (bt2 @ w3 + b3)
    w3_row = (g2.reshape(1, HIDDEN) * w3.reshape(1, HIDDEN)).astype(jnp.float32)
    b3_f = (bt2.reshape(1, HIDDEN) @ w3.reshape(HIDDEN, 1)
            + b3.reshape(1, 1)).astype(jnp.float32)
    b1_r = b1.reshape(1, HIDDEN).astype(jnp.float32)

    def const_spec(shape):
        # Constant block index -> Pallas keeps these resident in VMEM across
        # grid steps (no per-step re-fetch).
        return pl.BlockSpec(shape, lambda i: (0, 0))

    # Explicit VMEM budget (v5e's scoped default is only 16 MiB): x double
    # buffer + resident weights + generous activation-scratch estimate.
    est = (2 * bb * state_dim * x.dtype.itemsize     # x double-buffer
           + state_dim * HIDDEN * 2                  # w1 bf16
           + HIDDEN * HIDDEN * 2                     # w2 bf16
           + 8 * HIDDEN * 4                          # small vectors
           + 4 * bb * HIDDEN * 4                     # f32 activation temps
           + 2 * bb * 4)                             # out double-buffer
    vmem_limit = int(min(max(est + (2 << 20), 32 << 20), 60 << 20))

    out = pl.pallas_call(
        value_network_kernel,
        out_shape=jax.ShapeDtypeStruct((Bp, 1), jnp.float32),
        grid_spec=pltpu.PrefetchScalarGridSpec(
            num_scalar_prefetch=0,
            grid=(n_blk,),
            in_specs=[
                pl.BlockSpec((bb, state_dim), lambda i: (i, 0)),  # x tile
                const_spec((state_dim, HIDDEN)),   # w1 (bf16, resident)
                const_spec((1, HIDDEN)),           # b1
                const_spec((HIDDEN, HIDDEN)),      # w2 (bf16, g1 folded in)
                const_spec((1, HIDDEN)),           # b2 (bt1 folded in)
                const_spec((1, HIDDEN)),           # w3 row (g2 folded in)
                const_spec((1, 1)),                # b3 (bt2 folded in)
            ],
            out_specs=pl.BlockSpec((bb, 1), lambda i: (i, 0)),
        ),
        compiler_params=pltpu.CompilerParams(
            dimension_semantics=("parallel",),
            vmem_limit_bytes=vmem_limit),
    )(x_in, w1_b, b1_r, w2_f, b2_f, w3_row, b3_f)

    return out[:B]


def init_params(key, state_dim):
    """Deterministic init matching the PyTorch module: xavier_normal_ for
    Linear weights, 0 biases, LayerNorm gamma=1 / beta=0."""
    k1, k2, k3 = jax.random.split(key, 3)

    def xavier_normal(k, fan_in, fan_out):
        std = (2.0 / (fan_in + fan_out)) ** 0.5
        # stored as (in, out) so the kernel computes x @ W
        return jax.random.normal(k, (fan_in, fan_out), jnp.float32) * std

    w1 = xavier_normal(k1, state_dim, HIDDEN)
    b1 = jnp.zeros((1, HIDDEN), jnp.float32)
    g1 = jnp.ones((1, HIDDEN), jnp.float32)
    bt1 = jnp.zeros((1, HIDDEN), jnp.float32)

    w2 = xavier_normal(k2, HIDDEN, HIDDEN)
    b2 = jnp.zeros((1, HIDDEN), jnp.float32)
    g2 = jnp.ones((1, HIDDEN), jnp.float32)
    bt2 = jnp.zeros((1, HIDDEN), jnp.float32)

    w3 = xavier_normal(k3, HIDDEN, 1)
    b3 = jnp.zeros((1, 1), jnp.float32)

    return (w1, b1, g1, bt1, w2, b2, g2, bt2, w3, b3)


def _layernorm_affine(h, g, b):
    mu = jnp.mean(h, axis=-1, keepdims=True)
    var = jnp.mean((h - mu) * (h - mu), axis=-1, keepdims=True)
    return (h - mu) * lax.rsqrt(var + LN_EPS) * g + b


def value_network_ref(x, params):
    """Pure-JAX reference: standard (un-folded) LN affine, bf16 matmuls with
    f32 accumulation mirroring the kernel's MXU dtype path."""
    (w1, b1, g1, bt1, w2, b2, g2, bt2, w3, b3) = params
    h = jnp.dot(x.astype(jnp.bfloat16), w1.astype(jnp.bfloat16),
                preferred_element_type=jnp.float32) + b1
    h = jnp.maximum(h, 0.0)
    h = _layernorm_affine(h, g1, bt1)
    h = jnp.dot(h.astype(jnp.bfloat16), w2.astype(jnp.bfloat16),
                preferred_element_type=jnp.float32) + b2
    h = jnp.maximum(h, 0.0)
    h = _layernorm_affine(h, g2, bt2)
    return h @ w3 + b3


if __name__ == "__main__":
    key = jax.random.PRNGKey(0)
    k_param, k_x, k_g1, k_bt1, k_g2, k_bt2 = jax.random.split(key, 6)

    batch = 8
    state_dim = 32

    params = init_params(k_param, state_dim)
    x = jax.random.normal(k_x, (batch, state_dim), jnp.float32)

    # Test 1: module-default init (LayerNorm gamma=1, beta=0).
    out = jax.block_until_ready(value_network_forward(x, params))
    ref = value_network_ref(x, params)
    assert out.shape == (batch, 1), out.shape
    assert jnp.allclose(out, ref, atol=5e-3, rtol=5e-3), (
        f"max abs err {float(jnp.max(jnp.abs(out - ref)))}")

    # Test 2: non-trivial LayerNorm affines to exercise the trace-time
    # weight-folding algebra (same forward semantics as the PyTorch module).
    (w1, b1, g1, bt1, w2, b2, g2, bt2, w3, b3) = params
    g1p = g1 + 0.1 * jax.random.normal(k_g1, g1.shape, jnp.float32)
    bt1p = 0.1 * jax.random.normal(k_bt1, bt1.shape, jnp.float32)
    g2p = g2 + 0.1 * jax.random.normal(k_g2, g2.shape, jnp.float32)
    bt2p = 0.1 * jax.random.normal(k_bt2, bt2.shape, jnp.float32)
    params2 = (w1, b1, g1p, bt1p, w2, b2, g2p, bt2p, w3, b3)

    out2 = jax.block_until_ready(value_network_forward(x, params2))
    ref2 = value_network_ref(x, params2)
    assert jnp.allclose(out2, ref2, atol=2e-2, rtol=2e-2), (
        f"max abs err {float(jnp.max(jnp.abs(out2 - ref2)))}")

    print("KERNEL_OK")
</pallas_src>

<mosaic_0001>
module attributes {stable_mosaic.version = 11 : i64} {
  func.func @value_network_kernel(%arg0: i32, %arg1: memref<8x32xf32, #tpu.memory_space<vmem>>, %arg2: memref<32x256xbf16, #tpu.memory_space<vmem>>, %arg3: memref<1x256xf32, #tpu.memory_space<vmem>>, %arg4: memref<256x256xbf16, #tpu.memory_space<vmem>>, %arg5: memref<1x256xf32, #tpu.memory_space<vmem>>, %arg6: memref<1x256xf32, #tpu.memory_space<vmem>>, %arg7: memref<1x1xf32, #tpu.memory_space<vmem>>, %arg8: memref<8x1xf32, #tpu.memory_space<vmem>>) attributes {dimension_semantics = [#tpu.dimension_semantics<parallel>], iteration_bounds = array<i64: 1>, scalar_prefetch = 0 : i64, scratch_operands = 0 : i64, tpu.core_type = #tpu.core_type<tc>, window_params = [{transform_indices = @transform_0, window_bounds = array<i64: 8, 32>}, {pipeline_mode = #tpu.pipeline_mode<synchronous>, transform_indices = @transform_1, window_bounds = array<i64: 32, 256>}, {pipeline_mode = #tpu.pipeline_mode<synchronous>, transform_indices = @transform_2, window_bounds = array<i64: 1, 256>}, {pipeline_mode = #tpu.pipeline_mode<synchronous>, transform_indices = @transform_3, window_bounds = array<i64: 256, 256>}, {pipeline_mode = #tpu.pipeline_mode<synchronous>, transform_indices = @transform_4, window_bounds = array<i64: 1, 256>}, {pipeline_mode = #tpu.pipeline_mode<synchronous>, transform_indices = @transform_5, window_bounds = array<i64: 1, 256>}, {pipeline_mode = #tpu.pipeline_mode<synchronous>, transform_indices = @transform_6, window_bounds = array<i64: 1, 1>}, {transform_indices = @transform_7, window_bounds = array<i64: 8, 1>}]} {
    %c0 = arith.constant 0 : index
    %c0_0 = arith.constant 0 : index
    %0 = vector.load %arg1[%c0, %c0_0] : memref<8x32xf32, #tpu.memory_space<vmem>>, vector<8x32xf32>
    %1 = arith.truncf %0 : vector<8x32xf32> to vector<8x32xbf16>
    %c0_1 = arith.constant 0 : index
    %c0_2 = arith.constant 0 : index
    %2 = vector.load %arg2[%c0_1, %c0_2] : memref<32x256xbf16, #tpu.memory_space<vmem>>, vector<32x256xbf16>
    %cst = arith.constant dense<0.000000e+00> : vector<8x256xf32>
    %3 = tpu.matmul %1, %2, %cst {dimension_numbers = #tpu.dot_dimension_numbers<[1], [0], [0], [1], [0, 0, 1, 1], [], []>} : vector<8x32xbf16>, vector<32x256xbf16>, vector<8x256xf32> -> vector<8x256xf32>
    %c0_3 = arith.constant 0 : index
    %c0_4 = arith.constant 0 : index
    %4 = vector.load %arg3[%c0_3, %c0_4] : memref<1x256xf32, #tpu.memory_space<vmem>>, vector<1x256xf32>
    %5 = vector.broadcast %4 : vector<1x256xf32> to vector<8x256xf32>
    %6 = arith.addf %3, %5 : vector<8x256xf32>
    %cst_5 = arith.constant 0.000000e+00 : f32
    %7 = vector.broadcast %cst_5 : f32 to vector<8x256xf32>
    %8 = arith.maximumf %6, %7 : vector<8x256xf32>
    %cst_6 = arith.constant dense<0.000000e+00> : vector<8xf32>
    %9 = vector.multi_reduction <add>, %8, %cst_6 [1] : vector<8x256xf32> to vector<8xf32>
    %10 = vector.shape_cast %9 : vector<8xf32> to vector<8x1xf32>
    %cst_7 = arith.constant 2.560000e+02 : f32
    %11 = vector.broadcast %cst_7 : f32 to vector<8x1xf32>
    %12 = arith.divf %10, %11 : vector<8x1xf32>
    %13 = arith.mulf %8, %8 : vector<8x256xf32>
    %cst_8 = arith.constant dense<0.000000e+00> : vector<8xf32>
    %14 = vector.multi_reduction <add>, %13, %cst_8 [1] : vector<8x256xf32> to vector<8xf32>
    %15 = vector.shape_cast %14 : vector<8xf32> to vector<8x1xf32>
    %cst_9 = arith.constant 2.560000e+02 : f32
    %16 = vector.broadcast %cst_9 : f32 to vector<8x1xf32>
    %17 = arith.divf %15, %16 : vector<8x1xf32>
    %18 = arith.mulf %12, %12 : vector<8x1xf32>
    %19 = arith.subf %17, %18 : vector<8x1xf32>
    %cst_10 = arith.constant 0.000000e+00 : f32
    %20 = vector.broadcast %cst_10 : f32 to vector<8x1xf32>
    %21 = arith.maximumf %19, %20 : vector<8x1xf32>
    %22 = vector.broadcast %12 : vector<8x1xf32> to vector<8x256xf32>
    %23 = arith.subf %8, %22 : vector<8x256xf32>
    %cst_11 = arith.constant 9.99999974E-6 : f32
    %24 = vector.broadcast %cst_11 : f32 to vector<8x1xf32>
    %25 = arith.addf %21, %24 : vector<8x1xf32>
    %26 = math.rsqrt %25 : vector<8x1xf32>
    %27 = vector.broadcast %26 : vector<8x1xf32> to vector<8x256xf32>
    %28 = arith.mulf %23, %27 : vector<8x256xf32>
    %29 = arith.truncf %28 : vector<8x256xf32> to vector<8x256xbf16>
    %c0_12 = arith.constant 0 : index
    %c0_13 = arith.constant 0 : index
    %30 = vector.load %arg4[%c0_12, %c0_13] : memref<256x256xbf16, #tpu.memory_space<vmem>>, vector<256x256xbf16>
    %cst_14 = arith.constant dense<0.000000e+00> : vector<8x256xf32>
    %31 = tpu.matmul %29, %30, %cst_14 {dimension_numbers = #tpu.dot_dimension_numbers<[1], [0], [0], [1], [0, 0, 1, 1], [], []>} : vector<8x256xbf16>, vector<256x256xbf16>, vector<8x256xf32> -> vector<8x256xf32>
    %c0_15 = arith.constant 0 : index
    %c0_16 = arith.constant 0 : index
    %32 = vector.load %arg5[%c0_15, %c0_16] : memref<1x256xf32, #tpu.memory_space<vmem>>, vector<1x256xf32>
    %33 = vector.broadcast %32 : vector<1x256xf32> to vector<8x256xf32>
    %34 = arith.addf %31, %33 : vector<8x256xf32>
    %cst_17 = arith.constant 0.000000e+00 : f32
    %35 = vector.broadcast %cst_17 : f32 to vector<8x256xf32>
    %36 = arith.maximumf %34, %35 : vector<8x256xf32>
    %cst_18 = arith.constant dense<0.000000e+00> : vector<8xf32>
    %37 = vector.multi_reduction <add>, %36, %cst_18 [1] : vector<8x256xf32> to vector<8xf32>
    %38 = vector.shape_cast %37 : vector<8xf32> to vector<8x1xf32>
    %cst_19 = arith.constant 2.560000e+02 : f32
    %39 = vector.broadcast %cst_19 : f32 to vector<8x1xf32>
    %40 = arith.divf %38, %39 : vector<8x1xf32>
    %41 = arith.mulf %36, %36 : vector<8x256xf32>
    %cst_20 = arith.constant dense<0.000000e+00> : vector<8xf32>
    %42 = vector.multi_reduction <add>, %41, %cst_20 [1] : vector<8x256xf32> to vector<8xf32>
    %43 = vector.shape_cast %42 : vector<8xf32> to vector<8x1xf32>
    %cst_21 = arith.constant 2.560000e+02 : f32
    %44 = vector.broadcast %cst_21 : f32 to vector<8x1xf32>
    %45 = arith.divf %43, %44 : vector<8x1xf32>
    %46 = arith.mulf %40, %40 : vector<8x1xf32>
    %47 = arith.subf %45, %46 : vector<8x1xf32>
    %cst_22 = arith.constant 0.000000e+00 : f32
    %48 = vector.broadcast %cst_22 : f32 to vector<8x1xf32>
    %49 = arith.maximumf %47, %48 : vector<8x1xf32>
    %50 = vector.broadcast %40 : vector<8x1xf32> to vector<8x256xf32>
    %51 = arith.subf %36, %50 : vector<8x256xf32>
    %cst_23 = arith.constant 9.99999974E-6 : f32
    %52 = vector.broadcast %cst_23 : f32 to vector<8x1xf32>
    %53 = arith.addf %49, %52 : vector<8x1xf32>
    %54 = math.rsqrt %53 : vector<8x1xf32>
    %55 = vector.broadcast %54 : vector<8x1xf32> to vector<8x256xf32>
    %56 = arith.mulf %51, %55 : vector<8x256xf32>
    %c0_24 = arith.constant 0 : index
    %c0_25 = arith.constant 0 : index
    %57 = vector.load %arg6[%c0_24, %c0_25] : memref<1x256xf32, #tpu.memory_space<vmem>>, vector<1x256xf32>
    %58 = vector.broadcast %57 : vector<1x256xf32> to vector<8x256xf32>
    %59 = arith.mulf %56, %58 : vector<8x256xf32>
    %cst_26 = arith.constant dense<0.000000e+00> : vector<8xf32>
    %60 = vector.multi_reduction <add>, %59, %cst_26 [1] : vector<8x256xf32> to vector<8xf32>
    %61 = vector.shape_cast %60 : vector<8xf32> to vector<8x1xf32>
    %c0_27 = arith.constant 0 : index
    %c0_28 = arith.constant 0 : index
    %62 = vector.load %arg7[%c0_27, %c0_28] : memref<1x1xf32, #tpu.memory_space<vmem>>, vector<1x1xf32>
    %63 = vector.broadcast %62 : vector<1x1xf32> to vector<8x1xf32>
    %64 = arith.addf %61, %63 : vector<8x1xf32>
    %c0_29 = arith.constant 0 : index
    %c0_30 = arith.constant 0 : index
    %65 = vector.load %arg8[%c0_29, %c0_30] : memref<8x1xf32, #tpu.memory_space<vmem>>, vector<8x1xf32>
    tpu.vector_store %arg8[%c0_29, %c0_30], %64 {strides = array<i32>} : memref<8x1xf32, #tpu.memory_space<vmem>>, vector<8x1xf32>,
    return
  }
  func.func @transform_0(%arg0: i32) -> (i32, i32) {
    %c0_i32 = arith.constant 0 : i32
    %c0_i32_0 = arith.constant 0 : i32
    return %arg0, %c0_i32 : i32, i32
  }
  func.func @transform_1(%arg0: i32) -> (i32, i32) {
    %c0_i32 = arith.constant 0 : i32
    %c0_i32_0 = arith.constant 0 : i32
    %c0_i32_1 = arith.constant 0 : i32
    return %c0_i32, %c0_i32_0 : i32, i32
  }
  func.func @transform_2(%arg0: i32) -> (i32, i32) {
    %c0_i32 = arith.constant 0 : i32
    %c0_i32_0 = arith.constant 0 : i32
    %c0_i32_1 = arith.constant 0 : i32
    return %c0_i32, %c0_i32_0 : i32, i32
  }
  func.func @transform_3(%arg0: i32) -> (i32, i32) {
    %c0_i32 = arith.constant 0 : i32
    %c0_i32_0 = arith.constant 0 : i32
    %c0_i32_1 = arith.constant 0 : i32
    return %c0_i32, %c0_i32_0 : i32, i32
  }
  func.func @transform_4(%arg0: i32) -> (i32, i32) {
    %c0_i32 = arith.constant 0 : i32
    %c0_i32_0 = arith.constant 0 : i32
    %c0_i32_1 = arith.constant 0 : i32
    return %c0_i32, %c0_i32_0 : i32, i32
  }
  func.func @transform_5(%arg0: i32) -> (i32, i32) {
    %c0_i32 = arith.constant 0 : i32
    %c0_i32_0 = arith.constant 0 : i32
    %c0_i32_1 = arith.constant 0 : i32
    return %c0_i32, %c0_i32_0 : i32, i32
  }
  func.func @transform_6(%arg0: i32) -> (i32, i32) {
    %c0_i32 = arith.constant 0 : i32
    %c0_i32_0 = arith.constant 0 : i32
    %c0_i32_1 = arith.constant 0 : i32
    return %c0_i32, %c0_i32_0 : i32, i32
  }
  func.func @transform_7(%arg0: i32) -> (i32, i32) {
    %c0_i32 = arith.constant 0 : i32
    %c0_i32_0 = arith.constant 0 : i32
    return %arg0, %c0_i32 : i32, i32
  }
}

</mosaic_0001>

<bundles_post_ra>
// kernel: value_network_forward.1
= control target key start
LH: loop header
LB: loop body
LE: loop exit
PB: predicated region body
PF: predicated region fallthrough
CT: control target
= control target key end

     0   :  { %v530_v1 = vmov 0   ;;  %vm67_vm0 = vcmask 261120   ;;  %v37_v25 = vlaneseq  ;;  %vm427_vm1 = vcmask 7168   ;;  %s707_s1 = inlined_call_operand.vmem [shape: bf16[32,256], index: 1, kind: input, shape index: {}]   ;;  %s708_s0 = inlined_call_operand.vmem [shape: f32[8,32], index: 0, kind: input, shape index: {}]   ;;  %s709_s3 = inlined_call_operand.vmem [shape: bf16[256,256], index: 3, kind: input, shape index: {}]   ;;  %s710_s2 = inlined_call_operand.vmem [shape: f32[1,256], index: 2, kind: input, shape index: {}]   ;;  %s711_s4 = inlined_call_operand.vmem [shape: f32[1,256], index: 4, kind: input, shape index: {}]   ;;  %s712_s6 = inlined_call_operand.<no memory space> [shape: f32[1,1], index: 6, kind: input, shape index: {}]   ;;  %s713_s5 = inlined_call_operand.vmem [shape: f32[1,256], index: 5, kind: input, shape index: {}]   ;;  %s714_s7 = inlined_call_operand.vmem [shape: f32[8,1], index: 7, kind: output, shape index: {}]  }
   0x1   :  { %v472_v0 = vld [vmem:[%s707_s1 + $0x4] ss:$8 sps:$4 sm:$0xff]   ;;  %103 = vmatprep.mubr.bf16.mxu0 %v530_v1  ;;  %v474_v2 = vld [vmem:[%s707_s1] ss:$8 sps:$4 sm:$0xff]   ;;  %v475_v3 = vld [vmem:[%s707_s1 + $0x14] ss:$8 sps:$4 sm:$0xff]  }
   0x2   :  { %71 = vmatprep.subr.bf16.mxu0 %v472_v0  ;;  %v477_v4 = vld [vmem:[%s707_s1 + $0x10] ss:$8 sps:$4 sm:$0xff]   ;;  %v29_v5 = vld [vmem:[%s708_s0] sm:$0xff]  ;;  %v481_v9 = vld [vmem:[%s709_s3 + $0x14] ss:$8 sps:$4 sm:$0xff]   ;;  %v38_v26 = vshrl.u32 %v37_v25, 7 }
   0x3   :  { %72 = vmatpush1.bf16.msra.mxu0 %v474_v2  ;;  %v30_v6 = vpack.c.bf16 %v29_v5, %v29_v5  ;;  %v478_v7 = vld [vmem:[%s709_s3 + $0x4] ss:$8 sps:$4 sm:$0xff]   ;;  %v480_v8 = vld [vmem:[%s709_s3] ss:$8 sps:$4 sm:$0xff]   ;;  %v483_v10 = vld [vmem:[%s709_s3 + $0x10] ss:$8 sps:$4 sm:$0xff]  }
   0x4   :  { %73 = vmatprep.subr.bf16.mxu0 %v475_v3  ;;  %340 = vmatprep.subr.bf16.mxu1 %v478_v7  ;;  %v484_v11 = vld [vmem:[%s709_s3 + $0x24] ss:$8 sps:$4 sm:$0xff]   ;;  %v486_v12 = vld [vmem:[%s709_s3 + $0x20] ss:$8 sps:$4 sm:$0xff]   ;;  %v487_v13 = vld [vmem:[%s709_s3 + $0x34] ss:$8 sps:$4 sm:$0xff]  }
   0x5   :  { %341 = vmatpush1.bf16.msra.mxu1 %v480_v8  ;;  %v489_v14 = vld [vmem:[%s709_s3 + $0x30] ss:$8 sps:$4 sm:$0xff]   ;;  %v490_v15 = vld [vmem:[%s709_s3 + $0x44] ss:$8 sps:$4 sm:$0xff]   ;;  %v492_v16 = vld [vmem:[%s709_s3 + $0x40] ss:$8 sps:$4 sm:$0xff]  }
   0x6   :  { %342 = vmatprep.subr.bf16.mxu1 %v481_v9  ;;  %v493_v17 = vld [vmem:[%s709_s3 + $0x54] ss:$8 sps:$4 sm:$0xff]   ;;  %v495_v18 = vld [vmem:[%s709_s3 + $0x50] ss:$8 sps:$4 sm:$0xff]   ;;  %v496_v19 = vld [vmem:[%s709_s3 + $0x64] ss:$8 sps:$4 sm:$0xff]  }
   0x7   :  { %74 = vmatpush1.bf16.msra.mxu0 %v477_v4  ;;  %v498_v20 = vld [vmem:[%s709_s3 + $0x60] ss:$8 sps:$4 sm:$0xff]   ;;  %v499_v21 = vld [vmem:[%s709_s3 + $0x74] ss:$8 sps:$4 sm:$0xff]   ;;  %v501_v22 = vld [vmem:[%s709_s3 + $0x70] ss:$8 sps:$4 sm:$0xff]  }
   0x8   :  { %v502_v23 = vld [vmem:[%s709_s3 + $0x84] ss:$8 sps:$4 sm:$0xff]   ;;  %v504_v24 = vld [vmem:[%s709_s3 + $0x80] ss:$8 sps:$4 sm:$0xff]   ;;  %v640_v27 = vsub.s32 0, %v38_v26  ;;  %v645_v29 = vsub.s32 1, %v38_v26 }
   0x9   :  { %343 = vmatpush1.bf16.msra.mxu1 %v483_v10  ;;  %v35_v28 = vld [vmem:[%s710_s2] sm:$0x3]  ;;  %v505_v44 = vld [vmem:[%s709_s3 + $0x94] ss:$8 sps:$4 sm:$0xff]   ;;  %v507_v45 = vld [vmem:[%s709_s3 + $0x90] ss:$8 sps:$4 sm:$0xff]  }
   0xa   :  { %437 = vmatmul.mubr.msk.bf16.vlgmr.msra.gmra.mrb[0].mxu0 %vm67_vm0, %v30_v6  ;;  %344 = vmatprep.subr.bf16.mxu1 %v484_v11  ;;  %v40_v30 = vrot.slane %v35_v28, %v640_v27  ;;  %v44_v31 = vrot.slane %v35_v28, %v645_v29  ;;  %v508_v46 = vld [vmem:[%s709_s3 + $0xa4] ss:$8 sps:$4 sm:$0xff]   ;;  %v510_v47 = vld [vmem:[%s709_s3 + $0xa0] ss:$8 sps:$4 sm:$0xff]   ;;  %v511_v48 = vld [vmem:[%s709_s3 + $0xb4] ss:$8 sps:$4 sm:$0xff]  }
   0xb   :  { %v513_v49 = vld [vmem:[%s709_s3 + $0xb0] ss:$8 sps:$4 sm:$0xff]   ;;  %v514_v50 = vld [vmem:[%s709_s3 + $0xc4] ss:$8 sps:$4 sm:$0xff]   ;;  %v516_v51 = vld [vmem:[%s709_s3 + $0xc0] ss:$8 sps:$4 sm:$0xff]  }
   0xc   :  { %v517_v52 = vld [vmem:[%s709_s3 + $0xd4] ss:$8 sps:$4 sm:$0xff]   ;;  %v519_v53 = vld [vmem:[%s709_s3 + $0xd0] ss:$8 sps:$4 sm:$0xff]   ;;  %v520_v54 = vld [vmem:[%s709_s3 + $0xe4] ss:$8 sps:$4 sm:$0xff]  }
   0xd   :  { %345 = vmatpush1.bf16.msra.mxu1 %v486_v12  ;;  %v522_v55 = vld [vmem:[%s709_s3 + $0xe0] ss:$8 sps:$4 sm:$0xff]   ;;  %v523_v56 = vld [vmem:[%s709_s3 + $0xf4] ss:$8 sps:$4 sm:$0xff]   ;;  %v525_v57 = vld [vmem:[%s709_s3 + $0xf0] ss:$8 sps:$4 sm:$0xff]  }
   0xe   :  { %346 = vmatprep.subr.bf16.mxu1 %v487_v13  ;;  %v168_v9 = vld [vmem:[%s711_s4] sm:$0x3] }
   0xf   :  { %v173_v10 = vrot.slane %v168_v9, %v640_v27  ;;  %v177_v11 = vrot.slane %v168_v9, %v645_v29 }
  0x11   :  { %347 = vmatpush1.bf16.msra.mxu1 %v489_v14 }
  0x12   :  { %348 = vmatprep.subr.bf16.mxu1 %v490_v15 }
  0x15   :  { %349 = vmatpush1.bf16.msra.mxu1 %v492_v16 }
  0x16   :  { %350 = vmatprep.subr.bf16.mxu1 %v493_v17 }
  0x19   :  { %351 = vmatpush1.bf16.msra.mxu1 %v495_v18 }
  0x1a   :  { %352 = vmatprep.subr.bf16.mxu1 %v496_v19 }
  0x1d   :  { %353 = vmatpush1.bf16.msra.mxu1 %v498_v20 }
  0x1e   :  { %354 = vmatprep.subr.bf16.mxu1 %v499_v21 }
  0x21   :  { %355 = vmatpush1.bf16.msra.mxu1 %v501_v22 }
  0x22   :  { %356 = vmatprep.subr.bf16.mxu1 %v502_v23 }
  0x25   :  { %357 = vmatpush1.bf16.msra.mxu1 %v504_v24  ;;  %v12_v24 = vstv %s712_s6 }
  0x26   :  { %358 = vmatprep.subr.bf16.mxu1 %v505_v44  ;;  %13 = vst [vmem:[#allocation2] sm:$0x1] %v12_v24 }
  0x29   :  { %359 = vmatpush1.bf16.msra.mxu1 %v507_v45 }
  0x2a   :  { %360 = vmatprep.subr.bf16.mxu1 %v508_v46 }
  0x2d   :  { %361 = vmatpush1.bf16.msra.mxu1 %v510_v47  ;;  %v470_v46 = vld [vmem:[#allocation2] ss:$0 sm:$0xff] }
  0x2e   :  { %362 = vmatprep.subr.bf16.mxu1 %v511_v48 }
  0x31   :  { %363 = vmatpush1.bf16.msra.mxu1 %v513_v49 }
  0x32   :  { %364 = vmatprep.subr.bf16.mxu1 %v514_v50 }
  0x35   :  { %365 = vmatpush1.bf16.msra.mxu1 %v516_v51 }
  0x36   :  { %366 = vmatprep.subr.bf16.mxu1 %v517_v52 }
  0x39   :  { %367 = vmatpush1.bf16.msra.mxu1 %v519_v53 }
  0x3a   :  { %368 = vmatprep.subr.bf16.mxu1 %v520_v54 }
  0x3d   :  { %369 = vmatpush1.bf16.msra.mxu1 %v522_v55 }
  0x3e   :  { %370 = vmatprep.subr.bf16.mxu1 %v523_v56 }
  0x41   :  { %371 = vmatpush1.bf16.msra.mxu1 %v525_v57 }
  0xdd   :  { %v105_v32 = vpop.f32.mrb[0].mxu0 }
  0xde   :  { %v106_v33 = vadd.f32 %v105_v32, %v40_v30  ;;  %v107_v34 = vpop.f32.mrb[1].mxu0 }
  0xdf   :  { %v108_v35 = vadd.f32 %v107_v34, %v44_v31  ;;  %v109_v36 = vpop.f32.mrb[2].mxu0 }
  0xe0   :  { %v112_v37 = vmax.f32 %v106_v33, 0.0  ;;  %v110_v38 = vpop.f32.mrb[3].mxu0 }
  0xe1   :  { %v113_v39 = vmax.f32 %v108_v35, 0.0  ;;  %v402_v35 = vld [vmem:[%s713_s5] sm:$0x3] }
  0xe2   :  { %v119_v41 = vmul.f32 %v112_v37, %v112_v37  ;;  %v407_v38 = vrot.slane %v402_v35, %v640_v27 }
  0xe3   :  { %v114_v40 = vadd.f32 %v113_v39, %v112_v37  ;;  %v120_v42 = vmul.f32 %v113_v39, %v113_v39 }
  0xe5   :  { %115 = vadd.xlane.f32.xlu0 %v114_v40  ;;  %v121_v43 = vadd.f32 %v120_v42, %v119_v41 }
  0xe9   :  { %122 = vadd.xlane.f32.xlu0 %v121_v43 }
 0x172   :  { %v116_v58 = vpop.xlane.xlu0 %115 }
 0x173   :  { %v118_v59 = vmul.f32 0.00390625, %v116_v58 }
 0x175   :  { %v125_v61 = vmul.f32 %v118_v59, %v118_v59  ;;  %v128_v2 = vsub.f32 %v112_v37, %v118_v59  ;;  %v129_v3 = vsub.f32 %v113_v39, %v118_v59  ;;  %v411_v39 = vrot.slane %v402_v35, %v645_v29 }
 0x176   :  { %v123_v60 = vpop.xlane.xlu0 %122 }
 0x177   :  { %v124_v62 = vmul.f32 0.00390625, %v123_v60 }
 0x179   :  { %v126_v63 = vsub.f32 %v124_v62, %v125_v61 }
 0x17b   :  { %v127_v0 = vmax.f32 %v126_v63, 0.0 }
 0x17d   :  { %v130_v1 = vadd.f32 1e-05, %v127_v0 }
 0x17f   :  { %526 = vrsqrt.f32 %v130_v1 }
 0x189   :  { %v527_v4 = vpop.eup %526 }
 0x18a   :  { %v133_v5 = vmul.f32 %v527_v4, %v129_v3  ;;  %v132_v6 = vmul.f32 %v527_v4, %v128_v2 }
 0x18c   :  { %v135_v7 = vpack.c.bf16 %v133_v5, %v133_v5  ;;  %v134_v8 = vpack.c.bf16 %v132_v6, %v132_v6 }
 0x18e   :  { %372 = vmatprep.mubr.bf16.mxu1 %v135_v7 }
 0x18f   :  { %373 = vmatmul.mubr.bf16.vlgmr.msra.gmra.mrb[0].mxu1 %v134_v8 }
 0x262   :  { %v374_v12 = vpop.f32.mrb[0].mxu1 }
 0x263   :  { %v375_v13 = vadd.f32 %v374_v12, %v173_v10  ;;  %v376_v14 = vpop.f32.mrb[1].mxu1 }
 0x264   :  { %v377_v15 = vadd.f32 %v376_v14, %v177_v11  ;;  %v378_v16 = vpop.f32.mrb[2].mxu1 }
 0x265   :  { %v381_v17 = vmax.f32 %v375_v13, 0.0  ;;  %v379_v18 = vpop.f32.mrb[3].mxu1 }
 0x266   :  { %v382_v19 = vmax.f32 %v377_v15, 0.0 }
 0x267   :  { %v387_v21 = vmul.f32 %v381_v17, %v381_v17 }
 0x268   :  { %v383_v20 = vadd.f32 %v382_v19, %v381_v17  ;;  %v388_v22 = vmul.f32 %v382_v19, %v382_v19 }
 0x26a   :  { %384 = vadd.xlane.f32.xlu1 %v383_v20  ;;  %v389_v23 = vadd.f32 %v388_v22, %v387_v21 }
 0x26e   :  { %390 = vadd.xlane.f32.xlu1 %v389_v23 }
 0x2f7   :  { %v385_v25 = vpop.xlane.xlu1 %384 }
 0x2f8   :  { %v386_v26 = vmul.f32 0.00390625, %v385_v25 }
 0x2fa   :  { %v393_v30 = vmul.f32 %v386_v26, %v386_v26  ;;  %v396_v36 = vsub.f32 %v381_v17, %v386_v26  ;;  %v397_v37 = vsub.f32 %v382_v19, %v386_v26 }
 0x2fb   :  { %v391_v28 = vpop.xlane.xlu1 %390 }
 0x2fc   :  { %v392_v31 = vmul.f32 0.00390625, %v391_v28 }
 0x2fe   :  { %v394_v32 = vsub.f32 %v392_v31, %v393_v30 }
 0x300   :  { %v395_v33 = vmax.f32 %v394_v32, 0.0 }
 0x302   :  { %v398_v34 = vadd.f32 1e-05, %v395_v33 }
 0x304   :  { %528 = vrsqrt.f32 %v398_v34 }
 0x30e   :  { %v529_v40 = vpop.eup %528 }
 0x30f   :  { %v400_v41 = vmul.f32 %v529_v40, %v396_v36  ;;  %v401_v42 = vmul.f32 %v529_v40, %v397_v37 }
 0x311   :  { %v414_v43 = vmul.f32 %v407_v38, %v400_v41  ;;  %v415_v44 = vmul.f32 %v411_v39, %v401_v42 }
 0x313   :  { %v416_v45 = vadd.f32 %v415_v44, %v414_v43 }
 0x315   :  { %417 = vadd.xlane.f32.xlu0 %v416_v45 }
 0x3a2   :  { %v418_v47 = vpop.xlane.xlu0 %417 }
 0x3a3   :  { %v426_v48 = vadd.f32 %v470_v46, %v418_v47 }
 0x3a5   :  { %428 = vst.msk [vmem:[%s714_s7] sm:$0xff] %vm427_vm1, %v426_v48 }

</bundles_post_ra>
